<compile_context>
chip_gen: v5e
topology: v5e:2x2
jax: 0.10.0
libtpu: 0.0.40
codegen_flags: <defaults>
</compile_context>

<pallas_src>
import functools

import jax
import jax.numpy as jnp
from jax.experimental import pallas as pl
from jax.experimental.pallas import tpu as pltpu

BN_EPS = 1e-5
EXPANSION = 4  # Bottleneck expansion
VMEM_LIMIT_BYTES = 48 * 1024 * 1024  # headroom-safe on v5e/v6e (128 MiB) and v7x (64 MiB)


def _round_up(x, m):
    return (x + m - 1) // m * m


def _pick_tile(dim, max_tile):
    """Largest multiple of 128 that divides `dim` and is <= max_tile; else the full dim."""
    best = dim
    t = 128
    while t <= min(dim, max_tile):
        if dim % t == 0:
            best = t
        t += 128
    return best


# ---------------------------------------------------------------------------
# Pallas kernels
# ---------------------------------------------------------------------------
def _mm_bn_act_kernel(*refs, relu, has_res):
    """Tiled bf16 matmul, f32 accumulate, fused BN affine (+ residual) (+ ReLU)."""
    if has_res:
        x_ref, w_ref, s_ref, b_ref, r_ref, o_ref, acc_ref = refs
    else:
        x_ref, w_ref, s_ref, b_ref, o_ref, acc_ref = refs
        r_ref = None

    k = pl.program_id(2)

    @pl.when(k == 0)
    def _():
        acc_ref[...] = jnp.zeros_like(acc_ref)

    acc_ref[...] += jnp.dot(x_ref[...], w_ref[...],
                            preferred_element_type=jnp.float32)

    @pl.when(k == pl.num_programs(2) - 1)
    def _():
        y = acc_ref[...] * s_ref[...] + b_ref[...]
        if has_res:
            y = y + r_ref[...].astype(jnp.float32)
        if relu:
            y = jnp.maximum(y, 0.0)
        o_ref[...] = y.astype(o_ref.dtype)


def _maxpool_kernel(p_ref, o_ref):
    """Max over the 9 taps of a 3x3 pooling window. p_ref block: (9, tm, Cr)."""
    m = p_ref[0]
    for t in range(1, 9):
        m = jnp.maximum(m, p_ref[t])
    o_ref[...] = m


# ---------------------------------------------------------------------------
# Pallas wrappers
# ---------------------------------------------------------------------------
def matmul_scale_bias(x, w, scale, bias, relu, residual=None,
                      tm_max=256, tn_max=256, tk_max=512):
    """(M,K) @ (K,N) * scale[N] + bias[N] (+residual[M,N]), optional ReLU.

    x, w are expected in bf16; accumulation and epilogue are f32.
    """
    M, K = x.shape
    _, N = w.shape

    # --- K padding only when genuinely ragged (147 / 576 / 64), single K step if small.
    Kp = K if K % 128 == 0 else _round_up(K, 128)
    if Kp != K:
        x = jnp.pad(x, ((0, 0), (0, Kp - K)))
        w = jnp.pad(w, ((0, Kp - K), (0, 0)))
    tk = Kp if Kp <= 768 else _pick_tile(Kp, tk_max)

    # --- N tile divides the real channel count (all Cout are nice multiples).
    tn = _pick_tile(N, tn_max)

    # --- M tile adapted to the real M (deep layers have tiny M).
    tm = min(tm_max, _round_up(M, 8))
    Mp = _round_up(M, tm)
    if Mp != M:
        x = jnp.pad(x, ((0, Mp - M), (0, 0)))
        if residual is not None:
            residual = jnp.pad(residual, ((0, Mp - M), (0, 0)))

    s2 = scale.reshape(1, N).astype(jnp.float32)
    b2 = bias.reshape(1, N).astype(jnp.float32)

    in_specs = [
        pl.BlockSpec((tm, tk), lambda i, j, k: (i, k)),
        pl.BlockSpec((tk, tn), lambda i, j, k: (k, j)),
        pl.BlockSpec((1, tn), lambda i, j, k: (0, j)),
        pl.BlockSpec((1, tn), lambda i, j, k: (0, j)),
    ]
    inputs = [x, w, s2, b2]
    if residual is not None:
        in_specs.append(pl.BlockSpec((tm, tn), lambda i, j, k: (i, j)))
        inputs.append(residual.astype(jnp.float32))

    out = pl.pallas_call(
        functools.partial(_mm_bn_act_kernel, relu=relu,
                          has_res=residual is not None),
        out_shape=jax.ShapeDtypeStruct((Mp, N), jnp.float32),
        grid_spec=pltpu.PrefetchScalarGridSpec(
            num_scalar_prefetch=0,
            grid=(Mp // tm, N // tn, Kp // tk),
            in_specs=in_specs,
            out_specs=pl.BlockSpec((tm, tn), lambda i, j, k: (i, j)),
            scratch_shapes=[pltpu.VMEM((tm, tn), jnp.float32)],
        ),
        compiler_params=pltpu.CompilerParams(
            dimension_semantics=("parallel", "parallel", "arbitrary"),
            vmem_limit_bytes=VMEM_LIMIT_BYTES),
    )(*inputs)
    return out[:M, :] if Mp != M else out


def conv_bn(x, w, bn, *, stride, dilation, padding, relu, residual=None):
    """Conv2d (bias=False) + eval-mode BatchNorm + optional fused residual/ReLU.

    x: (N,H,W,Cin) NHWC float32; w: (Cout,Cin,Kh,Kw) torch OIHW layout.
    """
    N, H, W, Cin = x.shape
    Cout, _, Kh, Kw = w.shape
    Ho = (H + 2 * padding - dilation * (Kh - 1) - 1) // stride + 1
    Wo = (W + 2 * padding - dilation * (Kw - 1) - 1) // stride + 1

    xb = x.astype(jnp.bfloat16)  # bf16 MXU operands; f32 accumulate in-kernel

    if Kh == 1 and Kw == 1 and padding == 0:
        # 1x1 conv: no im2col, just (strided) reshape.
        if stride > 1:
            xb = xb[:, ::stride, ::stride, :]
        patches = xb.reshape(N * Ho * Wo, Cin)
        w2 = jnp.transpose(w.reshape(Cout, Cin), (1, 0)).astype(jnp.bfloat16)
    else:
        xp = jnp.pad(xb, ((0, 0), (padding, padding), (padding, padding), (0, 0)))
        taps = []
        for kh in range(Kh):
            for kw in range(Kw):
                h0, w0 = kh * dilation, kw * dilation
                taps.append(xp[:, h0:h0 + stride * (Ho - 1) + 1:stride,
                               w0:w0 + stride * (Wo - 1) + 1:stride, :])
        # im2col: (N*Ho*Wo, Kh*Kw*Cin), tap-major then channel (kh, kw, cin)
        patches = jnp.concatenate(taps, axis=-1).reshape(N * Ho * Wo, Kh * Kw * Cin)
        # OIHW -> (Kh, Kw, Cin, Cout) -> (Kh*Kw*Cin, Cout) matches patch ordering
        w2 = jnp.transpose(w, (2, 3, 1, 0)).reshape(Kh * Kw * Cin, Cout
                                                    ).astype(jnp.bfloat16)

    scale = bn['gamma'] / jnp.sqrt(bn['var'] + BN_EPS)
    bias = bn['beta'] - bn['mean'] * scale

    res2 = residual.reshape(N * Ho * Wo, Cout) if residual is not None else None
    y = matmul_scale_bias(patches, w2, scale, bias, relu, residual=res2)
    return y.reshape(N, Ho, Wo, Cout)


def maxpool_3x3_s2_p1(x):
    """MaxPool2d(kernel_size=3, stride=2, padding=1) on NHWC, gridded & lane-dense."""
    N, H, W, C = x.shape
    Ho = (H + 2 - 3) // 2 + 1
    Wo = (W + 2 - 3) // 2 + 1
    xp = jnp.pad(x, ((0, 0), (1, 1), (1, 1), (0, 0)), constant_values=-jnp.inf)
    taps = []
    for kh in range(3):
        for kw in range(3):
            taps.append(xp[:, kh:kh + 2 * (Ho - 1) + 1:2,
                           kw:kw + 2 * (Wo - 1) + 1:2, :])
    M = N * Ho * Wo
    pat = jnp.stack(taps, axis=0).reshape(9, M, C)

    # Fold rows so the last (lane) dim is 128-wide -> unmasked stores.
    fold = 128 // C if (C < 128 and 128 % C == 0 and M % (128 // C) == 0) else 1
    Mr, Cr = M // fold, C * fold
    pat = pat.reshape(9, Mr, Cr)

    tm = min(128, _round_up(Mr, 8))
    Mrp = _round_up(Mr, tm)
    if Mrp != Mr:
        pat = jnp.pad(pat, ((0, 0), (0, Mrp - Mr), (0, 0)))

    out = pl.pallas_call(
        _maxpool_kernel,
        out_shape=jax.ShapeDtypeStruct((Mrp, Cr), jnp.float32),
        grid_spec=pltpu.PrefetchScalarGridSpec(
            num_scalar_prefetch=0,
            grid=(Mrp // tm,),
            in_specs=[pl.BlockSpec((9, tm, Cr), lambda i: (0, i, 0))],
            out_specs=pl.BlockSpec((tm, Cr), lambda i: (i, 0)),
        ),
        compiler_params=pltpu.CompilerParams(
            dimension_semantics=("parallel",),
            vmem_limit_bytes=VMEM_LIMIT_BYTES),
    )(pat)
    out = out[:Mr] if Mrp != Mr else out
    return out.reshape(N, Ho, Wo, C)


# ---------------------------------------------------------------------------
# Parameter construction (deterministic, mirrors ResNet.__init__ / _init_weight)
# ---------------------------------------------------------------------------
def _kaiming(key, shape):
    # torch.nn.init.kaiming_normal_ default: fan_in, gain=sqrt(2)
    fan_in = shape[1] * shape[2] * shape[3]
    std = (2.0 / fan_in) ** 0.5
    return jax.random.normal(key, shape, jnp.float32) * std


def _make_bn(c):
    return dict(gamma=jnp.ones((c,), jnp.float32),
                beta=jnp.zeros((c,), jnp.float32),
                mean=jnp.zeros((c,), jnp.float32),
                var=jnp.ones((c,), jnp.float32))


def init_resnet_params(key, n_in, layers, os=16):
    if os == 16:
        strides, rates, mg_blocks = [1, 2, 2, 1], [1, 1, 1, 2], [1, 2, 4]
    elif os == 8:
        strides, rates, mg_blocks = [1, 2, 1, 1], [1, 1, 2, 2], [1, 2, 1]
    else:
        raise NotImplementedError

    keys = iter(jax.random.split(key, 256))
    params = {'conv1': _kaiming(next(keys), (64, n_in, 7, 7)),
              'bn1': _make_bn(64)}
    state = {'inplanes': 64}

    def make_bottleneck(inpl, planes, stride, rate, downsample):
        p = dict(
            w1=_kaiming(next(keys), (planes, inpl, 1, 1)), bn1=_make_bn(planes),
            w2=_kaiming(next(keys), (planes, planes, 3, 3)), bn2=_make_bn(planes),
            w3=_kaiming(next(keys), (planes * EXPANSION, planes, 1, 1)),
            bn3=_make_bn(planes * EXPANSION),
            stride=stride, rate=rate)
        if downsample:
            p['wd'] = _kaiming(next(keys), (planes * EXPANSION, inpl, 1, 1))
            p['bnd'] = _make_bn(planes * EXPANSION)
        return p

    def make_layer(planes, nblocks, stride, rate):
        ds = stride != 1 or state['inplanes'] != planes * EXPANSION
        layer = [make_bottleneck(state['inplanes'], planes, stride, rate, ds)]
        state['inplanes'] = planes * EXPANSION
        for _ in range(1, nblocks):
            layer.append(make_bottleneck(state['inplanes'], planes, 1, 1, False))
        return layer

    def make_mg_unit(planes, blocks, stride, rate):
        ds = stride != 1 or state['inplanes'] != planes * EXPANSION
        layer = [make_bottleneck(state['inplanes'], planes, stride,
                                 blocks[0] * rate, ds)]
        state['inplanes'] = planes * EXPANSION
        for i in range(1, len(blocks)):
            layer.append(make_bottleneck(state['inplanes'], planes, 1,
                                         blocks[i] * rate, False))
        return layer

    params['layer1'] = make_layer(64, layers[0], strides[0], rates[0])
    params['layer2'] = make_layer(128, layers[1], strides[1], rates[1])
    params['layer3'] = make_layer(256, layers[2], strides[2], rates[2])
    params['layer4'] = make_mg_unit(512, mg_blocks, strides[3], rates[3])
    return params


# ---------------------------------------------------------------------------
# Forward pass (matches ResNet.forward)
# ---------------------------------------------------------------------------
def bottleneck_forward(x, p):
    out = conv_bn(x, p['w1'], p['bn1'], stride=1, dilation=1, padding=0, relu=True)
    out = conv_bn(out, p['w2'], p['bn2'], stride=p['stride'],
                  dilation=p['rate'], padding=p['rate'], relu=True)
    if 'wd' in p:
        residual = conv_bn(x, p['wd'], p['bnd'], stride=p['stride'],
                           dilation=1, padding=0, relu=False)
    else:
        residual = x
    # conv3 + BN + residual add + ReLU fused into one Pallas matmul epilogue
    return conv_bn(out, p['w3'], p['bn3'], stride=1, dilation=1, padding=0,
                   relu=True, residual=residual)


def resnet_forward(params, x_nchw):
    x = jnp.transpose(x_nchw, (0, 2, 3, 1))  # NCHW -> NHWC (internal layout)
    x = conv_bn(x, params['conv1'], params['bn1'],
                stride=2, dilation=1, padding=3, relu=True)
    x = maxpool_3x3_s2_p1(x)
    low_level_feat = x
    for name in ('layer1', 'layer2', 'layer3', 'layer4'):
        for blk in params[name]:
            x = bottleneck_forward(x, blk)
    # back to NCHW to match the PyTorch module outputs
    return (jnp.transpose(x, (0, 3, 1, 2)),
            jnp.transpose(low_level_feat, (0, 3, 1, 2)))


if __name__ == "__main__":
    key = jax.random.PRNGKey(0)
    kp, kx = jax.random.split(key)

    # Small but consistent config: ResNet(nInputChannels=3, Bottleneck,
    # layers=[1,1,1,1], os=16); input (N=2, C=3, H=64, W=64) NCHW.
    params = init_resnet_params(kp, n_in=3, layers=[1, 1, 1, 1], os=16)
    x = jax.random.normal(kx, (2, 3, 64, 64), jnp.float32)

    out, low = resnet_forward(params, x)
    jax.block_until_ready((out, low))

    assert out.shape == (2, 512 * EXPANSION, 4, 4), out.shape      # os=16 -> 64/16
    assert low.shape == (2, 64, 16, 16), low.shape                 # post-maxpool
    assert bool(jnp.all(jnp.isfinite(out))) and bool(jnp.all(jnp.isfinite(low)))
    print("KERNEL_OK")
</pallas_src>

<mosaic_0001>
module attributes {stable_mosaic.version = 11 : i64} {
  func.func @_mm_bn_act_kernel(%arg0: i32, %arg1: i32, %arg2: i32, %arg3: memref<256x256xbf16, #tpu.memory_space<vmem>>, %arg4: memref<256x64xbf16, #tpu.memory_space<vmem>>, %arg5: memref<1x64xf32, #tpu.memory_space<vmem>>, %arg6: memref<1x64xf32, #tpu.memory_space<vmem>>, %arg7: memref<256x64xf32, #tpu.memory_space<vmem>>, %arg8: memref<256x64xf32, #tpu.memory_space<vmem>>) attributes {dimension_semantics = [#tpu.dimension_semantics<parallel>, #tpu.dimension_semantics<parallel>, #tpu.dimension_semantics<arbitrary>], iteration_bounds = array<i64: 8, 1, 1>, scalar_prefetch = 0 : i64, scratch_operands = 1 : i64, tpu.core_type = #tpu.core_type<tc>, window_params = [{transform_indices = @transform_0, window_bounds = array<i64: 256, 256>}, {transform_indices = @transform_1, window_bounds = array<i64: 256, 64>}, {transform_indices = @transform_2, window_bounds = array<i64: 1, 64>}, {transform_indices = @transform_3, window_bounds = array<i64: 1, 64>}, {transform_indices = @transform_4, window_bounds = array<i64: 256, 64>}]} {
    %c0_i32 = arith.constant 0 : i32
    %0 = arith.cmpi eq, %arg2, %c0_i32 : i32
    %1 = arith.extui %0 : i1 to i32
    %c0_i32_0 = arith.constant 0 : i32
    %2 = arith.cmpi ne, %1, %c0_i32_0 : i32
    scf.if %2 {
      %cst_10 = arith.constant 0.000000e+00 : f32
      %12 = vector.broadcast %cst_10 : f32 to vector<256x64xf32>
      %c0_11 = arith.constant 0 : index
      %c0_12 = arith.constant 0 : index
      %13 = vector.load %arg8[%c0_11, %c0_12] : memref<256x64xf32, #tpu.memory_space<vmem>>, vector<256x64xf32>
      tpu.vector_store %arg8[%c0_11, %c0_12], %12 {strides = array<i32>} : memref<256x64xf32, #tpu.memory_space<vmem>>, vector<256x64xf32>,
    } else {
    }
    %c0 = arith.constant 0 : index
    %c0_1 = arith.constant 0 : index
    %3 = vector.load %arg8[%c0, %c0_1] : memref<256x64xf32, #tpu.memory_space<vmem>>, vector<256x64xf32>
    %c0_2 = arith.constant 0 : index
    %c0_3 = arith.constant 0 : index
    %4 = vector.load %arg3[%c0_2, %c0_3] : memref<256x256xbf16, #tpu.memory_space<vmem>>, vector<256x256xbf16>
    %c0_4 = arith.constant 0 : index
    %c0_5 = arith.constant 0 : index
    %5 = vector.load %arg4[%c0_4, %c0_5] : memref<256x64xbf16, #tpu.memory_space<vmem>>, vector<256x64xbf16>
    %cst = arith.constant dense<0.000000e+00> : vector<256x64xf32>
    %6 = tpu.matmul %4, %5, %cst {dimension_numbers = #tpu.dot_dimension_numbers<[1], [0], [0], [1], [0, 0, 1, 1], [], []>} : vector<256x256xbf16>, vector<256x64xbf16>, vector<256x64xf32> -> vector<256x64xf32>
    %7 = arith.addf %3, %6 : vector<256x64xf32>
    %c0_6 = arith.constant 0 : index
    %c0_7 = arith.constant 0 : index
    %8 = vector.load %arg8[%c0_6, %c0_7] : memref<256x64xf32, #tpu.memory_space<vmem>>, vector<256x64xf32>
    tpu.vector_store %arg8[%c0_6, %c0_7], %7 {strides = array<i32>} : memref<256x64xf32, #tpu.memory_space<vmem>>, vector<256x64xf32>,
    %c0_i32_8 = arith.constant 0 : i32
    %9 = arith.cmpi eq, %arg2, %c0_i32_8 : i32
    %10 = arith.extui %9 : i1 to i32
    %c0_i32_9 = arith.constant 0 : i32
    %11 = arith.cmpi ne, %10, %c0_i32_9 : i32
    scf.if %11 {
      %c0_10 = arith.constant 0 : index
      %c0_11 = arith.constant 0 : index
      %12 = vector.load %arg8[%c0_10, %c0_11] : memref<256x64xf32, #tpu.memory_space<vmem>>, vector<256x64xf32>
      %c0_12 = arith.constant 0 : index
      %c0_13 = arith.constant 0 : index
      %13 = vector.load %arg5[%c0_12, %c0_13] : memref<1x64xf32, #tpu.memory_space<vmem>>, vector<1x64xf32>
      %14 = vector.broadcast %13 : vector<1x64xf32> to vector<256x64xf32>
      %15 = arith.mulf %12, %14 : vector<256x64xf32>
      %c0_14 = arith.constant 0 : index
      %c0_15 = arith.constant 0 : index
      %16 = vector.load %arg6[%c0_14, %c0_15] : memref<1x64xf32, #tpu.memory_space<vmem>>, vector<1x64xf32>
      %17 = vector.broadcast %16 : vector<1x64xf32> to vector<256x64xf32>
      %18 = arith.addf %15, %17 : vector<256x64xf32>
      %cst_16 = arith.constant 0.000000e+00 : f32
      %19 = vector.broadcast %cst_16 : f32 to vector<256x64xf32>
      %20 = arith.maximumf %18, %19 : vector<256x64xf32>
      %c0_17 = arith.constant 0 : index
      %c0_18 = arith.constant 0 : index
      %21 = vector.load %arg7[%c0_17, %c0_18] : memref<256x64xf32, #tpu.memory_space<vmem>>, vector<256x64xf32>
      tpu.vector_store %arg7[%c0_17, %c0_18], %20 {strides = array<i32>} : memref<256x64xf32, #tpu.memory_space<vmem>>, vector<256x64xf32>,
    } else {
    }
    return
  }
  func.func @transform_0(%arg0: i32, %arg1: i32, %arg2: i32) -> (i32, i32) {
    %c0_i32 = arith.constant 0 : i32
    return %arg0, %arg2 : i32, i32
  }
  func.func @transform_1(%arg0: i32, %arg1: i32, %arg2: i32) -> (i32, i32) {
    %c0_i32 = arith.constant 0 : i32
    return %arg2, %arg1 : i32, i32
  }
  func.func @transform_2(%arg0: i32, %arg1: i32, %arg2: i32) -> (i32, i32) {
    %c0_i32 = arith.constant 0 : i32
    %c0_i32_0 = arith.constant 0 : i32
    return %c0_i32, %arg1 : i32, i32
  }
  func.func @transform_3(%arg0: i32, %arg1: i32, %arg2: i32) -> (i32, i32) {
    %c0_i32 = arith.constant 0 : i32
    %c0_i32_0 = arith.constant 0 : i32
    return %c0_i32, %arg1 : i32, i32
  }
  func.func @transform_4(%arg0: i32, %arg1: i32, %arg2: i32) -> (i32, i32) {
    %c0_i32 = arith.constant 0 : i32
    return %arg0, %arg1 : i32, i32
  }
}

</mosaic_0001>

<bundles_post_ra>
// kernel: tpu_custom_call.1
= control target key start
LH: loop header
LB: loop body
LE: loop exit
PB: predicated region body
PF: predicated region fallthrough
CT: control target
= control target key end

     0   :  { %9 = vsyncpa [#allocation4], 0  ;;  %s2103_s0 = inlined_call_operand.hbm [shape: bf16[2048,256], index: 0, kind: input, shape index: {}]   ;;  %s2104_s1 = inlined_call_operand.vmem [shape: bf16[256,64], index: 1, kind: input, shape index: {}]   ;;  %s2105_s2 = inlined_call_operand.vmem [shape: f32[1,64], index: 2, kind: input, shape index: {}]   ;;  %s2106_s3 = inlined_call_operand.vmem [shape: f32[1,64], index: 3, kind: input, shape index: {}]   ;;  %s2107_s4 = inlined_call_operand.vmem [shape: f32[2048,64], index: 4, kind: output, shape index: {}]  }
   0x1   :  { %11 = vsyncpa [#allocation4 + $0x1], 0  ;;  %s1698_s15 = smov 0   ;;  %s1700_s16 = smov 0  }
   0x2   :  { %s1702_s17 = smov 0   ;;  %s1704_s18 = smov 0  }
   0x3   :  { %s1706_s19 = smov 0   ;;  %s1708_s20 = smov 0  }
   0x4 LB: > { %s1253_s21 = sadd.s32 4294967295, %s1668_s20   ;;  %s36_s22 = sadd.s32 1, %s1664_s19  ;;  %s1668_s20 = sphi %s1708_s20, %s17_s20   ;;  %s1664_s19 = sphi %s1706_s19, %s2114_s19   ;;  %s1660_s18 = sphi %s1704_s18, %s2113_s18   ;;  %s1656_s17 = sphi %s1702_s17, %s2112_s17   ;;  %s1652_s16 = sphi %s1700_s16, %s2111_s16   ;;  %s1648_s15 = sphi %s1698_s15, %s2110_s15  }
   0x5   : > { %p38_p0 = scmp.ge.s32.totalorder %s36_s22, 8  ;;  %s45_s23 = sadd.s32 1, %s1656_s17 }
   0x6   : > { %p52_p1 = scmp.ne.s32.totalorder %s1656_s17, %s1652_s16  ;;  %p53_p2 = scmp.eq.s32.totalorder %s1668_s20, 0 }
   0x7   : > { %s2116_s22 = smov (%p38_p0, %s36_s22), 0  ;;  %p58_p4 = scmp.ne.s32.totalorder %s1652_s16, %s1648_s15 }
   0x8   : > { %p1734_p3 = por %p53_p2, %p52_p1  ;;  %s40_s25 = ssub.s32 %s1664_s19, %s2116_s22 }
   0x9   : > { %p59_p5 = scmp.eq.s32.totalorder %s1253_s21, 0  ;;  %p43_p6 = scmp.eq.s32.totalorder %s40_s25, 0 }
   0xa   : > { %p1534_p8 = scmp.lt.s32.totalorder %s1668_s20, 8  ;;  %s214_s28 = sand.u32 1, %s1656_s17  }
   0xb   : > { %p1741_p7 = por %p59_p5, %p58_p4  ;;  %s1463_s29 = sshll.u32 %s1664_s19, 8 }
   0xc   : > { %s1747_s27 = scalar_select %p43_p6, %s1656_s17, %s45_s23  }
   0xd   : > { %s1260_s30 = sshll.u32 %s214_s28, 8  ;;  %s226_s7 = scalar_lea.hbm %s2103_s0, %s1463_s29 }
   0xe   : > { %s227_s8 = sshll.u32 %s226_s7, 4  ;;  %s218_s9 = scalar_lea.vmem [#allocation3], %s1260_s30  ;;  %s228_s8 = int_to_ptr.hbm [resolvable:$true] %s227_s8 }
   0xf   : > { %s229_s10 = sshll.u32 %s218_s9, 4  ;;  %p1531_p9 = pnand %p1534_p8, %p1734_p3  ;;  %s230_s10 = int_to_ptr.vmem [resolvable:$true] %s229_s10 }
  0x10   : > { %p1264_p10 = scmp.ge.s32.totalorder %s1668_s20, 1  ;;  %p237_p11 = scmp.lt.s32.totalorder %s1668_s20, 9 }
  0x11   : > { %s215_s11 = scalar_lea.sflag [#allocation4], %s214_s28  ;;  %s1670_s12 = smov 128  }
  0x12   : > { %s1671_s13 = smov 8   ;;  %p238_p12 = pnand %p1264_p10, %p237_p11 }
  0x13   : > { %1533 = dma.hbm_to_vmem [thread:$0]  (!%p1531_p9), %s228_s8, 4096, %s230_s10, %s215_s11, %s1670_s12, %s1670_s12, %s1671_s13  }
  0x14   : > { %241 = sbr.rel (%p238_p12) target bundleno = 331 (0x14b), region = 36  ;;  %s243_s14 = sand.u32 (!%p238_p12), 1, %s1652_s16  }
  0x15   : > { %s1265_s15 = sshll.u32 (!%p238_p12), %s243_s14, 8  ;;  %s244_s21 = scalar_lea.sflag (!%p238_p12), [#allocation4], %s243_s14 }
  0x16   : > { %s1759_s23 = scalar_lea.vmem (!%p238_p12), [#allocation3], %s1265_s15 }
  0x19   : > { %1643 = dma.done.wait (%p1741_p7), %s244_s21, 4096  }
  0x1a   : > { %1645 = vsyncadd (%p1741_p7), %s244_s21, 4294963200  ;;  %v1503_v0 = vld [vmem:[%s2104_s1 + $0x38] sm:$0xff]  ;;  %v1502_v2 = vld [vmem:[%s2104_s1 + $0x30] sm:$0xff]  ;;  %vm320_vm0 = vcmask 523264  }
  0x1b   : > { %v1511_v1 = vld [vmem:[%s2104_s1 + $0x78] sm:$0xff]  ;;  %705 = vmatpush.bf16.msra.mxu0 %v1503_v0  ;;  %1512 = vmatpush.bf16.msra.mxu2 %v1503_v0  ;;  %v1510_v3 = vld [vmem:[%s2104_s1 + $0x70] sm:$0xff]  ;;  %v1501_v4 = vld [vmem:[%s2104_s1 + $0x28] sm:$0xff] }
  0x1c   : > { %794 = vmatpush.bf16.msra.mxu1 %v1511_v1  ;;  %1520 = vmatpush.bf16.msra.mxu3 %v1511_v1  ;;  %v1509_v5 = vld [vmem:[%s2104_s1 + $0x68] sm:$0xff]  ;;  %v1500_v6 = vld [vmem:[%s2104_s1 + $0x20] sm:$0xff]  ;;  %v1499_v8 = vld [vmem:[%s2104_s1 + $0x18] sm:$0xff] }
  0x1d   : > { %v1508_v7 = vld [vmem:[%s2104_s1 + $0x60] sm:$0xff]  ;;  %v1507_v9 = vld [vmem:[%s2104_s1 + $0x58] sm:$0xff]  ;;  %v1498_v10 = vld [vmem:[%s2104_s1 + $0x10] sm:$0xff] }
  0x1e   : > { %v1506_v11 = vld [vmem:[%s2104_s1 + $0x50] sm:$0xff]  ;;  %v1497_v12 = vld [vmem:[%s2104_s1 + $0x8] sm:$0xff]  ;;  %v1496_v14 = vld [vmem:[%s2104_s1] sm:$0xff] }
  0x1f   : > { %706 = vmatpush.bf16.msra.mxu0 %v1502_v2  ;;  %1513 = vmatpush.bf16.msra.mxu2 %v1502_v2  ;;  %v1505_v13 = vld [vmem:[%s2104_s1 + $0x48] sm:$0xff]  ;;  %v1504_v15 = vld [vmem:[%s2104_s1 + $0x40] sm:$0xff]  ;;  %v1278_v28 = vld [vmem:[%s1759_s23 + $0x10] sm:$0xf] }
  0x20   : > { %795 = vmatpush.bf16.msra.mxu1 %v1510_v3  ;;  %1521 = vmatpush.bf16.msra.mxu3 %v1510_v3  ;;  %v1270_v16 = vld [vmem:[%s1759_s23] sm:$0xf]  ;;  %v1465_v17 = vld [vmem:[%s1759_s23 + $0x4] sm:$0xf0]  ;;  %v1464_v20 = vld [vmem:[%s1759_s23 + $0x4] sm:$0xf] }
  0x21   : > { %v1334_v18 = vld [vmem:[%s1759_s23 + $0x80] sm:$0xf]  ;;  %v1481_v19 = vld [vmem:[%s1759_s23 + $0x84] sm:$0xf0]  ;;  %v1272_v21 = vld [vmem:[%s1759_s23 + $0x8] sm:$0xf0]  ;;  %v1271_v24 = vor.u32 %v1465_v17, %v1270_v16 }
  0x22   : > { %v1480_v22 = vld [vmem:[%s1759_s23 + $0x84] sm:$0xf]  ;;  %v1336_v23 = vld [vmem:[%s1759_s23 + $0x88] sm:$0xf0]  ;;  %v1335_v25 = vor.u32 %v1481_v19, %v1334_v18  ;;  %v1275_v26 = vor.u32 %v1464_v20, %v1272_v21  ;;  %v1467_v29 = vld [vmem:[%s1759_s23 + $0x14] sm:$0xf0] }
  0x23   : > { %707 = vmatpush.bf16.msra.mxu0 %v1501_v4  ;;  %1514 = vmatpush.bf16.msra.mxu2 %v1501_v4  ;;  %v1339_v27 = vor.u32 %v1480_v22, %v1336_v23  ;;  %v1342_v30 = vld [vmem:[%s1759_s23 + $0x90] sm:$0xf]  ;;  %v1483_v31 = vld [vmem:[%s1759_s23 + $0x94] sm:$0xf0]  ;;  %v1466_v32 = vld [vmem:[%s1759_s23 + $0x14] sm:$0xf]  ;;  %v1279_v36 = vor.u32 %v1467_v29, %v1278_v28 }
  0x24   : > { %796 = vmatpush.bf16.msra.mxu1 %v1509_v5  ;;  %1522 = vmatpush.bf16.msra.mxu3 %v1509_v5  ;;  %v1280_v33 = vld [vmem:[%s1759_s23 + $0x18] sm:$0xf0]  ;;  %v1482_v34 = vld [vmem:[%s1759_s23 + $0x94] sm:$0xf]  ;;  %v1343_v37 = vor.u32 %v1483_v31, %v1342_v30  ;;  %v1286_v40 = vld [vmem:[%s1759_s23 + $0x20] sm:$0xf] }
  0x25   : > { %v1344_v35 = vld [vmem:[%s1759_s23 + $0x98] sm:$0xf0]  ;;  %v1283_v38 = vor.u32 %v1466_v32, %v1280_v33  ;;  %v1469_v41 = vld [vmem:[%s1759_s23 + $0x24] sm:$0xf0]  ;;  %v1350_v42 = vld [vmem:[%s1759_s23 + $0xa0] sm:$0xf] }
  0x26   : > { %v1347_v39 = vor.u32 %v1482_v34, %v1344_v35  ;;  %v1485_v43 = vld [vmem:[%s1759_s23 + $0xa4] sm:$0xf0]  ;;  %v1468_v44 = vld [vmem:[%s1759_s23 + $0x24] sm:$0xf]  ;;  %v1288_v45 = vld [vmem:[%s1759_s23 + $0x28] sm:$0xf0]  ;;  %v1287_v48 = vor.u32 %v1469_v41, %v1286_v40 }
  0x27   : > { %708 = vmatpush.bf16.msra.mxu0 %v1500_v6  ;;  %1515 = vmatpush.bf16.msra.mxu2 %v1500_v6  ;;  %v1484_v46 = vld [vmem:[%s1759_s23 + $0xa4] sm:$0xf]  ;;  %v1352_v47 = vld [vmem:[%s1759_s23 + $0xa8] sm:$0xf0]  ;;  %v1351_v49 = vor.u32 %v1485_v43, %v1350_v42  ;;  %v1291_v50 = vor.u32 %v1468_v44, %v1288_v45  ;;  %v1294_v52 = vld [vmem:[%s1759_s23 + $0x30] sm:$0xf] }
  0x28   : > { %797 = vmatpush.bf16.msra.mxu1 %v1508_v7  ;;  %1523 = vmatpush.bf16.msra.mxu3 %v1508_v7  ;;  %v1355_v51 = vor.u32 %v1484_v46, %v1352_v47  ;;  %v1471_v53 = vld [vmem:[%s1759_s23 + $0x34] sm:$0xf0]  ;;  %v1358_v54 = vld [vmem:[%s1759_s23 + $0xb0] sm:$0xf]  ;;  %v1470_v56 = vld [vmem:[%s1759_s23 + $0x34] sm:$0xf] }
  0x29   : > { %v1487_v55 = vld [vmem:[%s1759_s23 + $0xb4] sm:$0xf0]  ;;  %v1296_v57 = vld [vmem:[%s1759_s23 + $0x38] sm:$0xf0]  ;;  %v1486_v58 = vld [vmem:[%s1759_s23 + $0xb4] sm:$0xf]  ;;  %v1295_v60 = vor.u32 %v1471_v53, %v1294_v52 }
  0x2a   : > { %v1360_v59 = vld [vmem:[%s1759_s23 + $0xb8] sm:$0xf0]  ;;  %v1359_v61 = vor.u32 %v1487_v55, %v1358_v54  ;;  %v1299_v62 = vor.u32 %v1470_v56, %v1296_v57  ;;  %v1302_v0 = vld [vmem:[%s1759_s23 + $0x40] sm:$0xf]  ;;  %v1473_v1 = vld [vmem:[%s1759_s23 + $0x44] sm:$0xf0] }
  0x2b   : > { %709 = vmatpush.bf16.msra.mxu0 %v1499_v8  ;;  %1516 = vmatpush.bf16.msra.mxu2 %v1499_v8  ;;  %v1363_v63 = vor.u32 %v1486_v58, %v1360_v59  ;;  %v1366_v2 = vld [vmem:[%s1759_s23 + $0xc0] sm:$0xf]  ;;  %v1489_v3 = vld [vmem:[%s1759_s23 + $0xc4] sm:$0xf0]  ;;  %v1472_v4 = vld [vmem:[%s1759_s23 + $0x44] sm:$0xf]  ;;  %v1303_v8 = vor.u32 %v1473_v1, %v1302_v0 }
  0x2c   : > { %798 = vmatpush.bf16.msra.mxu1 %v1507_v9  ;;  %1524 = vmatpush.bf16.msra.mxu3 %v1507_v9  ;;  %v1304_v5 = vld [vmem:[%s1759_s23 + $0x48] sm:$0xf0]  ;;  %v1488_v6 = vld [vmem:[%s1759_s23 + $0xc4] sm:$0xf]  ;;  %v1367_v9 = vor.u32 %v1489_v3, %v1366_v2  ;;  %v1474_v16 = vld [vmem:[%s1759_s23 + $0x54] sm:$0xf] }
  0x2d   : > { %v1368_v7 = vld [vmem:[%s1759_s23 + $0xc8] sm:$0xf0]  ;;  %v1312_v17 = vld [vmem:[%s1759_s23 + $0x58] sm:$0xf0]  ;;  %v1490_v18 = vld [vmem:[%s1759_s23 + $0xd4] sm:$0xf] }
  0x2e   : > { %v1376_v19 = vld [vmem:[%s1759_s23 + $0xd8] sm:$0xf0]  ;;  %v1315_v22 = vor.u32 %v1474_v16, %v1312_v17  ;;  %v1476_v28 = vld [vmem:[%s1759_s23 + $0x64] sm:$0xf]  ;;  %v1320_v29 = vld [vmem:[%s1759_s23 + $0x68] sm:$0xf0] }
  0x2f   : > { %710 = vmatpush.bf16.msra.mxu0 %v1498_v10  ;;  %1517 = vmatpush.bf16.msra.mxu2 %v1498_v10  ;;  %v1307_v10 = vor.u32 %v1472_v4, %v1304_v5  ;;  %v1379_v23 = vor.u32 %v1490_v18, %v1376_v19  ;;  %v1492_v30 = vld [vmem:[%s1759_s23 + $0xe4] sm:$0xf]  ;;  %v1384_v31 = vld [vmem:[%s1759_s23 + $0xe8] sm:$0xf0]  ;;  %v1323_v34 = vor.u32 %v1476_v28, %v1320_v29  ;;  %v1495_v40 = vld [vmem:[%s1759_s23 + $0xf4] sm:$0xf0] }
  0x30   : > { %799 = vmatpush.bf16.msra.mxu1 %v1506_v11  ;;  %1525 = vmatpush.bf16.msra.mxu3 %v1506_v11  ;;  %v1371_v11 = vor.u32 %v1488_v6, %v1368_v7  ;;  %v1387_v35 = vor.u32 %v1492_v30, %v1384_v31  ;;  %v1478_v41 = vld [vmem:[%s1759_s23 + $0x74] sm:$0xf]  ;;  %v1328_v42 = vld [vmem:[%s1759_s23 + $0x78] sm:$0xf0]  ;;  %v1919_v0 = vld [vmem:[%s2106_s3] ss:$0 sm:$0xff] }
  0x31   : > { %v1494_v43 = vld [vmem:[%s1759_s23 + $0xf4] sm:$0xf]  ;;  %v1392_v44 = vld [vmem:[%s1759_s23 + $0xf8] sm:$0xf0]  ;;  %v1331_v47 = vor.u32 %v1478_v41, %v1328_v42 }
  0x33   : > { %711 = vmatpush.bf16.msra.mxu0 %v1497_v12  ;;  %1518 = vmatpush.bf16.msra.mxu2 %v1497_v12  ;;  %v1310_v12 = vld [vmem:[%s1759_s23 + $0x50] sm:$0xf] }
  0x34   : > { %800 = vmatpush.bf16.msra.mxu1 %v1505_v13  ;;  %1526 = vmatpush.bf16.msra.mxu3 %v1505_v13  ;;  %v1475_v13 = vld [vmem:[%s1759_s23 + $0x54] sm:$0xf0] }
  0x35   : > { %v1311_v20 = vor.u32 %v1475_v13, %v1310_v12 }
  0x37   : > { %712 = vmatpush.bf16.msra.mxu0 %v1496_v14  ;;  %1519 = vmatpush.bf16.msra.mxu2 %v1496_v14  ;;  %v1374_v14 = vld [vmem:[%s1759_s23 + $0xd0] sm:$0xf] }
  0x38   : > { %801 = vmatpush.bf16.msra.mxu1 %v1504_v15  ;;  %1527 = vmatpush.bf16.msra.mxu3 %v1504_v15  ;;  %v1491_v15 = vld [vmem:[%s1759_s23 + $0xd4] sm:$0xf0] }
  0x39   : > { %v1375_v21 = vor.u32 %v1491_v15, %v1374_v14 }
  0x3a   : > { %713 = vmatmul.bf16.vlgmr.msra.gmra.mxu0 %v1271_v24  ;;  %753 = vmatmul.bf16.vlgmr.msra.gmra.mxu2 %v1335_v25  ;;  %v1318_v24 = vld [vmem:[%s1759_s23 + $0x60] sm:$0xf]  ;;  %v1477_v25 = vld [vmem:[%s1759_s23 + $0x64] sm:$0xf0] }
  0x3b   : > { %802 = vmatmul.bf16.vlgmr.msra.gmra.mxu1 %v1275_v26  ;;  %842 = vmatmul.bf16.vlgmr.msra.gmra.mxu3 %v1339_v27  ;;  %v1382_v26 = vld [vmem:[%s1759_s23 + $0xe0] sm:$0xf]  ;;  %v1493_v27 = vld [vmem:[%s1759_s23 + $0xe4] sm:$0xf0]  ;;  %v1319_v32 = vor.u32 %v1477_v25, %v1318_v24 }
  0x3c   : > { %v1383_v33 = vor.u32 %v1493_v27, %v1382_v26 }
  0x4a   : > { %718 = vmatmul.bf16.gmra.mxu0 %v1279_v36  ;;  %758 = vmatmul.bf16.gmra.mxu2 %v1343_v37  ;;  %v1672_v36 = vmov 0.0   ;;  %v1326_v37 = vld [vmem:[%s1759_s23 + $0x70] sm:$0xf] }
  0x4b   : > { %807 = vmatmul.bf16.gmra.mxu1 %v1283_v38  ;;  %847 = vmatmul.bf16.gmra.mxu3 %v1347_v39  ;;  %321 = vst.msk [vmem:[#allocation2] sm:$0xff] %vm320_vm0, %v1672_v36  ;;  %v1479_v38 = vld [vmem:[%s1759_s23 + $0x74] sm:$0xf0]  ;;  %v1390_v39 = vld [vmem:[%s1759_s23 + $0xf0] sm:$0xf]  ;;  %s1266_s23 = sshll.u32 %s1660_s18, 5 }
  0x4c   : > { %322 = vst.msk [vmem:[#allocation2 + $0x8] sm:$0xff] %vm320_vm0, %v1672_v36  ;;  %v1327_v45 = vor.u32 %v1479_v38, %v1326_v37  ;;  %v1391_v46 = vor.u32 %v1495_v40, %v1390_v39  ;;  %p308_p13 = scmp.lt.s32.totalorder %s1266_s23, 255 }
  0x4d   : > { %323 = vst.msk [vmem:[#allocation2 + $0x10] sm:$0xff] %vm320_vm0, %v1672_v36 }
  0x4e   : > { %324 = vst.msk [vmem:[#allocation2 + $0x18] sm:$0xff] %vm320_vm0, %v1672_v36  ;;  %s2118_s23 = smov (!%p308_p13, %s1266_s23), 255 }
  0x4f   : > { %325 = vst.msk [vmem:[#allocation2 + $0x20] sm:$0xff] %vm320_vm0, %v1672_v36  ;;  %s1267_s21 = sshll.u32 %s2118_s23, 3 }
  0x50   : > { %326 = vst.msk [vmem:[#allocation2 + $0x28] sm:$0xff] %vm320_vm0, %v1672_v36  ;;  %s1928_s28 = scalar_lea.vmem %s2107_s4, %s1267_s21 }
  0x51   : > { %327 = vst.msk [vmem:[#allocation2 + $0x30] sm:$0xff] %vm320_vm0, %v1672_v36 }
  0x52   : > { %328 = vst.msk [vmem:[#allocation2 + $0x38] sm:$0xff] %vm320_vm0, %v1672_v36 }
  0x53   : > { %329 = vst.msk [vmem:[#allocation2 + $0x40] sm:$0xff] %vm320_vm0, %v1672_v36  ;;  %v354_v59 = vld [vmem:[#allocation2 + $0x8] sm:$0xff] }
  0x54   : > { %330 = vst.msk [vmem:[#allocation2 + $0x48] sm:$0xff] %vm320_vm0, %v1672_v36 }
  0x55   : > { %331 = vst.msk [vmem:[#allocation2 + $0x50] sm:$0xff] %vm320_vm0, %v1672_v36  ;;  %v356_v28 = vld [vmem:[#allocation2 + $0x18] sm:$0xff] }
  0x56   : > { %332 = vst.msk [vmem:[#allocation2 + $0x58] sm:$0xff] %vm320_vm0, %v1672_v36 }
  0x57   : > { %333 = vst.msk [vmem:[#allocation2 + $0x60] sm:$0xff] %vm320_vm0, %v1672_v36 }
  0x58   : > { %334 = vst.msk [vmem:[#allocation2 + $0x68] sm:$0xff] %vm320_vm0, %v1672_v36 }
  0x59   : > { %335 = vst.msk [vmem:[#allocation2 + $0x70] sm:$0xff] %vm320_vm0, %v1672_v36 }
  0x5a   : > { %723 = vmatmul.bf16.gmra.mxu0 %v1287_v48  ;;  %763 = vmatmul.bf16.gmra.mxu2 %v1351_v49  ;;  %v1395_v48 = vor.u32 %v1494_v43, %v1392_v44  ;;  %336 = vst.msk [vmem:[#allocation2 + $0x78] sm:$0xff] %vm320_vm0, %v1672_v36 }
  0x5b   : > { %812 = vmatmul.bf16.gmra.mxu1 %v1291_v50  ;;  %852 = vmatmul.bf16.gmra.mxu3 %v1355_v51  ;;  %337 = vst.msk [vmem:[#allocation2 + $0x80] sm:$0xff] %vm320_vm0, %v1672_v36  ;;  %v353_v50 = vld [vmem:[#allocation2] sm:$0xff] }
  0x5c   : > { %338 = vst.msk [vmem:[#allocation2 + $0x88] sm:$0xff] %vm320_vm0, %v1672_v36 }
  0x5d   : > { %339 = vst.msk [vmem:[#allocation2 + $0x90] sm:$0xff] %vm320_vm0, %v1672_v36 }
  0x5e   : > { %340 = vst.msk [vmem:[#allocation2 + $0x98] sm:$0xff] %vm320_vm0, %v1672_v36 }
  0x5f   : > { %341 = vst.msk [vmem:[#allocation2 + $0xa0] sm:$0xff] %vm320_vm0, %v1672_v36 }
  0x60   : > { %342 = vst.msk [vmem:[#allocation2 + $0xa8] sm:$0xff] %vm320_vm0, %v1672_v36 }
  0x61   : > { %343 = vst.msk [vmem:[#allocation2 + $0xb0] sm:$0xff] %vm320_vm0, %v1672_v36 }
  0x62   : > { %344 = vst.msk [vmem:[#allocation2 + $0xb8] sm:$0xff] %vm320_vm0, %v1672_v36  ;;  %v369_v55 = vld [vmem:[#allocation2 + $0x80] sm:$0xff] }
  0x63   : > { %345 = vst.msk [vmem:[#allocation2 + $0xc0] sm:$0xff] %vm320_vm0, %v1672_v36  ;;  %v370_v5 = vld [vmem:[#allocation2 + $0x88] sm:$0xff] }
  0x64   : > { %346 = vst.msk [vmem:[#allocation2 + $0xc8] sm:$0xff] %vm320_vm0, %v1672_v36 }
  0x65   : > { %347 = vst.msk [vmem:[#allocation2 + $0xd0] sm:$0xff] %vm320_vm0, %v1672_v36  ;;  %v372_v40 = vld [vmem:[#allocation2 + $0x98] sm:$0xff] }
  0x66   : > { %348 = vst.msk [vmem:[#allocation2 + $0xd8] sm:$0xff] %vm320_vm0, %v1672_v36 }
  0x67   : > { %349 = vst.msk [vmem:[#allocation2 + $0xe0] sm:$0xff] %vm320_vm0, %v1672_v36 }
  0x68   : > { %350 = vst.msk [vmem:[#allocation2 + $0xe8] sm:$0xff] %vm320_vm0, %v1672_v36 }
  0x69   : > { %351 = vst.msk [vmem:[#allocation2 + $0xf0] sm:$0xff] %vm320_vm0, %v1672_v36 }
  0x6a   : > { %728 = vmatmul.bf16.gmra.mxu0 %v1295_v60  ;;  %768 = vmatmul.bf16.gmra.mxu2 %v1359_v61  ;;  %352 = vst.msk [vmem:[#allocation2 + $0xf8] sm:$0xff] %vm320_vm0, %v1672_v36  ;;  %v1914_v61 = vld [vmem:[%s2105_s2] ss:$0 sm:$0xff] }
  0x6b   : > { %817 = vmatmul.bf16.gmra.mxu1 %v1299_v62  ;;  %857 = vmatmul.bf16.gmra.mxu3 %v1363_v63 }
  0x7a   : > { %733 = vmatmul.bf16.gmra.mxu0 %v1303_v8  ;;  %773 = vmatmul.bf16.gmra.mxu2 %v1367_v9 }
  0x7b   : > { %822 = vmatmul.bf16.gmra.mxu1 %v1307_v10  ;;  %862 = vmatmul.bf16.gmra.mxu3 %v1371_v11  ;;  %v355_v10 = vld [vmem:[#allocation2 + $0x10] sm:$0xff] }
  0x8a   : > { %738 = vmatmul.bf16.gmra.mxu0 %v1311_v20  ;;  %778 = vmatmul.bf16.gmra.mxu2 %v1375_v21 }
  0x8b   : > { %827 = vmatmul.bf16.gmra.mxu1 %v1315_v22  ;;  %867 = vmatmul.bf16.gmra.mxu3 %v1379_v23  ;;  %v371_v22 = vld [vmem:[#allocation2 + $0x90] sm:$0xff] }
  0x9a   : > { %743 = vmatmul.bf16.gmra.mxu0 %v1319_v32  ;;  %783 = vmatmul.bf16.gmra.mxu2 %v1383_v33 }
  0x9b   : > { %832 = vmatmul.bf16.gmra.mxu1 %v1323_v34  ;;  %872 = vmatmul.bf16.gmra.mxu3 %v1387_v35 }
  0xaa   : > { %748 = vmatmul.bf16.gmra.mxu0 %v1327_v45  ;;  %788 = vmatmul.bf16.gmra.mxu2 %v1391_v46  ;;  %v357_v46 = vld [vmem:[#allocation2 + $0x20] sm:$0xff] }
  0xab   : > { %837 = vmatmul.bf16.gmra.mxu1 %v1331_v47  ;;  %877 = vmatmul.bf16.gmra.mxu3 %v1395_v48 }
  0xb7   : > { %v714_v49 = vpop.f32.mrf.mxu0 }
  0xb8   : > { %v803_v51 = vpop.f32.mrf.mxu1 }
  0xb9   : > { %v804_v52 = vadd.f32 %v803_v51, %v714_v49 }
  0xbb   : > { %v883_v53 = vadd.f32 %v804_v52, %v353_v50 }
  0xbd   : > { %916 = vst.msk [vmem:[#allocation2] sm:$0xff] %vm320_vm0, %v883_v53  ;;  %v754_v54 = vpop.f32.mrf.mxu2 }
  0xbe   : > { %v843_v56 = vpop.f32.mrf.mxu3 }
  0xbf   : > { %v844_v57 = vadd.f32 %v843_v56, %v754_v54  ;;  %v716_v58 = vpop.f32.mrf.mxu0 }
  0xc0   : > { %v805_v60 = vpop.f32.mrf.mxu1 }
  0xc1   : > { %v899_v62 = vadd.f32 %v844_v57, %v369_v55  ;;  %v806_v63 = vadd.f32 %v805_v60, %v716_v58  ;;  %v373_v58 = vld [vmem:[#allocation2 + $0xa0] sm:$0xff] }
  0xc3   : > { %932 = vst.msk [vmem:[#allocation2 + $0x80] sm:$0xff] %vm320_vm0, %v899_v62  ;;  %v884_v1 = vadd.f32 %v806_v63, %v354_v59 }
  0xc4   : > { %v951_v2 = vld [vmem:[#allocation2] sm:$0xff] }
  0xc5   : > { %v987_v3 = vmul.f32 %v1914_v61, %v951_v2  ;;  %917 = vst.msk [vmem:[#allocation2 + $0x8] sm:$0xff] %vm320_vm0, %v884_v1  ;;  %v756_v4 = vpop.f32.mrf.mxu2  ;;  %v358_v2 = vld [vmem:[#allocation2 + $0x28] sm:$0xff] }
  0xc6   : > { %v845_v6 = vpop.f32.mrf.mxu3 }
  0xc7   : > { %v1023_v7 = vadd.f32 %v1919_v0, %v987_v3  ;;  %v846_v8 = vadd.f32 %v845_v6, %v756_v4  ;;  %v719_v9 = vpop.f32.mrf.mxu0 }
  0xc8   : > { %v808_v11 = vpop.f32.mrf.mxu1 }
  0xc9   : > { %v1055_v12 = vmax.f32 %v1023_v7, 0.0  ;;  %v900_v13 = vadd.f32 %v846_v8, %v370_v5  ;;  %v809_v14 = vadd.f32 %v808_v11, %v719_v9 }
  0xca   : > { %v967_v15 = vld [vmem:[#allocation2 + $0x80] sm:$0xff] }
  0xcb   : > { %1087 = vst.msk [vmem:[%s1928_s28] sm:$0xff] %vm320_vm0, %v1055_v12  ;;  %v1003_v16 = vmul.f32 %v1914_v61, %v967_v15  ;;  %v885_v17 = vadd.f32 %v809_v14, %v355_v10  ;;  %v374_v14 = vld [vmem:[#allocation2 + $0xa8] sm:$0xff] }
  0xcc   : > { %v952_v18 = vld [vmem:[#allocation2 + $0x8] sm:$0xff]  ;;  %933 = vst.msk [vmem:[#allocation2 + $0x88] sm:$0xff] %vm320_vm0, %v900_v13 }
  0xcd   : > { %v1039_v19 = vadd.f32 %v1919_v0, %v1003_v16  ;;  %v988_v20 = vmul.f32 %v1914_v61, %v952_v18  ;;  %918 = vst.msk [vmem:[#allocation2 + $0x10] sm:$0xff] %vm320_vm0, %v885_v17  ;;  %v759_v21 = vpop.f32.mrf.mxu2 }
  0xce   : > { %v848_v23 = vpop.f32.mrf.mxu3 }
  0xcf   : > { %v1071_v24 = vmax.f32 %v1039_v19, 0.0  ;;  %v1024_v25 = vadd.f32 %v1919_v0, %v988_v20  ;;  %v849_v26 = vadd.f32 %v848_v23, %v759_v21  ;;  %v721_v27 = vpop.f32.mrf.mxu0  ;;  %v359_v20 = vld [vmem:[#allocation2 + $0x30] sm:$0xff] }
  0xd0   : > { %v810_v29 = vpop.f32.mrf.mxu1 }
  0xd1   : > { %1103 = vst.msk [vmem:[%s1928_s28 + $0x80] sm:$0xff] %vm320_vm0, %v1071_v24  ;;  %v1056_v30 = vmax.f32 %v1024_v25, 0.0  ;;  %v901_v31 = vadd.f32 %v849_v26, %v371_v22  ;;  %v811_v32 = vadd.f32 %v810_v29, %v721_v27 }
  0xd3   : > { %1088 = vst.msk [vmem:[%s1928_s28 + $0x8] sm:$0xff] %vm320_vm0, %v1056_v30  ;;  %v968_v33 = vld [vmem:[#allocation2 + $0x88] sm:$0xff]  ;;  %v886_v34 = vadd.f32 %v811_v32, %v356_v28  ;;  %v375_v32 = vld [vmem:[#allocation2 + $0xb0] sm:$0xff] }
  0xd4   : > { %v1004_v35 = vmul.f32 %v1914_v61, %v968_v33  ;;  %v953_v36 = vld [vmem:[#allocation2 + $0x10] sm:$0xff]  ;;  %934 = vst.msk [vmem:[#allocation2 + $0x90] sm:$0xff] %vm320_vm0, %v901_v31 }
  0xd5   : > { %v989_v37 = vmul.f32 %v1914_v61, %v953_v36  ;;  %919 = vst.msk [vmem:[#allocation2 + $0x18] sm:$0xff] %vm320_vm0, %v886_v34  ;;  %v761_v38 = vpop.f32.mrf.mxu2 }
  0xd6   : > { %v1040_v39 = vadd.f32 %v1919_v0, %v1004_v35  ;;  %v850_v41 = vpop.f32.mrf.mxu3 }
  0xd7   : > { %v1025_v42 = vadd.f32 %v1919_v0, %v989_v37  ;;  %v851_v43 = vadd.f32 %v850_v41, %v761_v38  ;;  %v724_v44 = vpop.f32.mrf.mxu0  ;;  %v360_v38 = vld [vmem:[#allocation2 + $0x38] sm:$0xff] }
  0xd8   : > { %v1072_v45 = vmax.f32 %v1040_v39, 0.0  ;;  %v813_v47 = vpop.f32.mrf.mxu1 }
  0xd9   : > { %v1057_v48 = vmax.f32 %v1025_v42, 0.0  ;;  %v902_v49 = vadd.f32 %v851_v43, %v372_v40  ;;  %v814_v50 = vadd.f32 %v813_v47, %v724_v44 }
  0xda   : > { %1104 = vst.msk [vmem:[%s1928_s28 + $0x88] sm:$0xff] %vm320_vm0, %v1072_v45 }
  0xdb   : > { %1089 = vst.msk [vmem:[%s1928_s28 + $0x10] sm:$0xff] %vm320_vm0, %v1057_v48  ;;  %v969_v51 = vld [vmem:[#allocation2 + $0x90] sm:$0xff]  ;;  %v887_v52 = vadd.f32 %v814_v50, %v357_v46  ;;  %v376_v50 = vld [vmem:[#allocation2 + $0xb8] sm:$0xff] }
  0xdc   : > { %v1005_v53 = vmul.f32 %v1914_v61, %v969_v51  ;;  %v954_v54 = vld [vmem:[#allocation2 + $0x18] sm:$0xff]  ;;  %935 = vst.msk [vmem:[#allocation2 + $0x98] sm:$0xff] %vm320_vm0, %v902_v49 }
  0xdd   : > { %v990_v55 = vmul.f32 %v1914_v61, %v954_v54  ;;  %920 = vst.msk [vmem:[#allocation2 + $0x20] sm:$0xff] %vm320_vm0, %v887_v52  ;;  %v764_v56 = vpop.f32.mrf.mxu2 }
  0xde   : > { %v1041_v57 = vadd.f32 %v1919_v0, %v1005_v53  ;;  %v853_v59 = vpop.f32.mrf.mxu3 }
  0xdf   : > { %v1026_v60 = vadd.f32 %v1919_v0, %v990_v55  ;;  %v854_v62 = vadd.f32 %v853_v59, %v764_v56  ;;  %v726_v63 = vpop.f32.mrf.mxu0  ;;  %v361_v56 = vld [vmem:[#allocation2 + $0x40] sm:$0xff] }
  0xe0   : > { %v1073_v1 = vmax.f32 %v1041_v57, 0.0  ;;  %v815_v3 = vpop.f32.mrf.mxu1 }
  0xe1   : > { %v1058_v4 = vmax.f32 %v1026_v60, 0.0  ;;  %v903_v5 = vadd.f32 %v854_v62, %v373_v58  ;;  %v816_v6 = vadd.f32 %v815_v3, %v726_v63 }
  0xe2   : > { %1105 = vst.msk [vmem:[%s1928_s28 + $0x90] sm:$0xff] %vm320_vm0, %v1073_v1 }
  0xe3   : > { %1090 = vst.msk [vmem:[%s1928_s28 + $0x18] sm:$0xff] %vm320_vm0, %v1058_v4  ;;  %v970_v7 = vld [vmem:[#allocation2 + $0x98] sm:$0xff]  ;;  %v888_v8 = vadd.f32 %v816_v6, %v358_v2  ;;  %v377_v6 = vld [vmem:[#allocation2 + $0xc0] sm:$0xff] }
  0xe4   : > { %v1006_v9 = vmul.f32 %v1914_v61, %v970_v7  ;;  %v955_v10 = vld [vmem:[#allocation2 + $0x20] sm:$0xff]  ;;  %936 = vst.msk [vmem:[#allocation2 + $0xa0] sm:$0xff] %vm320_vm0, %v903_v5 }
  0xe5   : > { %v991_v11 = vmul.f32 %v1914_v61, %v955_v10  ;;  %921 = vst.msk [vmem:[#allocation2 + $0x28] sm:$0xff] %vm320_vm0, %v888_v8  ;;  %v766_v12 = vpop.f32.mrf.mxu2 }
  0xe6   : > { %v1042_v13 = vadd.f32 %v1919_v0, %v1006_v9  ;;  %v855_v15 = vpop.f32.mrf.mxu3 }
  0xe7   : > { %v1027_v16 = vadd.f32 %v1919_v0, %v991_v11  ;;  %v856_v17 = vadd.f32 %v855_v15, %v766_v12  ;;  %v729_v18 = vpop.f32.mrf.mxu0  ;;  %v362_v12 = vld [vmem:[#allocation2 + $0x48] sm:$0xff] }
  0xe8   : > { %v1074_v19 = vmax.f32 %v1042_v13, 0.0  ;;  %v818_v21 = vpop.f32.mrf.mxu1 }
  0xe9   : > { %v1059_v22 = vmax.f32 %v1027_v16, 0.0  ;;  %v904_v23 = vadd.f32 %v856_v17, %v374_v14  ;;  %v819_v24 = vadd.f32 %v818_v21, %v729_v18 }
  0xea   : > { %1106 = vst.msk [vmem:[%s1928_s28 + $0x98] sm:$0xff] %vm320_vm0, %v1074_v19 }
  0xeb   : > { %1091 = vst.msk [vmem:[%s1928_s28 + $0x20] sm:$0xff] %vm320_vm0, %v1059_v22  ;;  %v971_v25 = vld [vmem:[#allocation2 + $0xa0] sm:$0xff]  ;;  %v889_v26 = vadd.f32 %v819_v24, %v359_v20  ;;  %v378_v24 = vld [vmem:[#allocation2 + $0xc8] sm:$0xff] }
  0xec   : > { %v1007_v27 = vmul.f32 %v1914_v61, %v971_v25  ;;  %v956_v28 = vld [vmem:[#allocation2 + $0x28] sm:$0xff]  ;;  %937 = vst.msk [vmem:[#allocation2 + $0xa8] sm:$0xff] %vm320_vm0, %v904_v23 }
  0xed   : > { %v992_v29 = vmul.f32 %v1914_v61, %v956_v28  ;;  %922 = vst.msk [vmem:[#allocation2 + $0x30] sm:$0xff] %vm320_vm0, %v889_v26  ;;  %v769_v30 = vpop.f32.mrf.mxu2 }
  0xee   : > { %v1043_v31 = vadd.f32 %v1919_v0, %v1007_v27  ;;  %v858_v33 = vpop.f32.mrf.mxu3 }
  0xef   : > { %v1028_v34 = vadd.f32 %v1919_v0, %v992_v29  ;;  %v859_v35 = vadd.f32 %v858_v33, %v769_v30  ;;  %v731_v36 = vpop.f32.mrf.mxu0  ;;  %v363_v30 = vld [vmem:[#allocation2 + $0x50] sm:$0xff] }
  0xf0   : > { %v1075_v37 = vmax.f32 %v1043_v31, 0.0  ;;  %v820_v39 = vpop.f32.mrf.mxu1 }
  0xf1   : > { %v1060_v40 = vmax.f32 %v1028_v34, 0.0  ;;  %v905_v41 = vadd.f32 %v859_v35, %v375_v32  ;;  %v821_v42 = vadd.f32 %v820_v39, %v731_v36 }
  0xf2   : > { %1107 = vst.msk [vmem:[%s1928_s28 + $0xa0] sm:$0xff] %vm320_vm0, %v1075_v37 }
  0xf3   : > { %1092 = vst.msk [vmem:[%s1928_s28 + $0x28] sm:$0xff] %vm320_vm0, %v1060_v40  ;;  %v972_v43 = vld [vmem:[#allocation2 + $0xa8] sm:$0xff]  ;;  %v890_v44 = vadd.f32 %v821_v42, %v360_v38  ;;  %v379_v42 = vld [vmem:[#allocation2 + $0xd0] sm:$0xff] }
  0xf4   : > { %v1008_v45 = vmul.f32 %v1914_v61, %v972_v43  ;;  %v957_v46 = vld [vmem:[#allocation2 + $0x30] sm:$0xff]  ;;  %938 = vst.msk [vmem:[#allocation2 + $0xb0] sm:$0xff] %vm320_vm0, %v905_v41 }
  0xf5   : > { %v993_v47 = vmul.f32 %v1914_v61, %v957_v46  ;;  %923 = vst.msk [vmem:[#allocation2 + $0x38] sm:$0xff] %vm320_vm0, %v890_v44  ;;  %v771_v48 = vpop.f32.mrf.mxu2 }
  0xf6   : > { %v1044_v49 = vadd.f32 %v1919_v0, %v1008_v45  ;;  %v860_v51 = vpop.f32.mrf.mxu3 }
  0xf7   : > { %v1029_v52 = vadd.f32 %v1919_v0, %v993_v47  ;;  %v861_v53 = vadd.f32 %v860_v51, %v771_v48  ;;  %v734_v54 = vpop.f32.mrf.mxu0  ;;  %v364_v48 = vld [vmem:[#allocation2 + $0x58] sm:$0xff] }
  0xf8   : > { %v1076_v55 = vmax.f32 %v1044_v49, 0.0  ;;  %v823_v57 = vpop.f32.mrf.mxu1 }
  0xf9   : > { %v1061_v58 = vmax.f32 %v1029_v52, 0.0  ;;  %v906_v59 = vadd.f32 %v861_v53, %v376_v50  ;;  %v824_v60 = vadd.f32 %v823_v57, %v734_v54 }
  0xfa   : > { %1108 = vst.msk [vmem:[%s1928_s28 + $0xa8] sm:$0xff] %vm320_vm0, %v1076_v55 }
  0xfb   : > { %1093 = vst.msk [vmem:[%s1928_s28 + $0x30] sm:$0xff] %vm320_vm0, %v1061_v58  ;;  %v973_v62 = vld [vmem:[#allocation2 + $0xb0] sm:$0xff]  ;;  %v891_v63 = vadd.f32 %v824_v60, %v361_v56  ;;  %v380_v60 = vld [vmem:[#allocation2 + $0xd8] sm:$0xff] }
  0xfc   : > { %v1009_v1 = vmul.f32 %v1914_v61, %v973_v62  ;;  %v958_v2 = vld [vmem:[#allocation2 + $0x38] sm:$0xff]  ;;  %939 = vst.msk [vmem:[#allocation2 + $0xb8] sm:$0xff] %vm320_vm0, %v906_v59 }
  0xfd   : > { %v994_v3 = vmul.f32 %v1914_v61, %v958_v2  ;;  %924 = vst.msk [vmem:[#allocation2 + $0x40] sm:$0xff] %vm320_vm0, %v891_v63  ;;  %v774_v4 = vpop.f32.mrf.mxu2 }
  0xfe   : > { %v1045_v5 = vadd.f32 %v1919_v0, %v1009_v1  ;;  %v863_v7 = vpop.f32.mrf.mxu3 }
  0xff   : > { %v1030_v8 = vadd.f32 %v1919_v0, %v994_v3  ;;  %v864_v9 = vadd.f32 %v863_v7, %v774_v4  ;;  %v736_v10 = vpop.f32.mrf.mxu0  ;;  %v365_v4 = vld [vmem:[#allocation2 + $0x60] sm:$0xff] }
 0x100   : > { %v1077_v11 = vmax.f32 %v1045_v5, 0.0  ;;  %v825_v13 = vpop.f32.mrf.mxu1 }
 0x101   : > { %v1062_v14 = vmax.f32 %v1030_v8, 0.0  ;;  %v907_v15 = vadd.f32 %v864_v9, %v377_v6  ;;  %v826_v16 = vadd.f32 %v825_v13, %v736_v10 }
 0x102   : > { %1109 = vst.msk [vmem:[%s1928_s28 + $0xb0] sm:$0xff] %vm320_vm0, %v1077_v11 }
 0x103   : > { %1094 = vst.msk [vmem:[%s1928_s28 + $0x38] sm:$0xff] %vm320_vm0, %v1062_v14  ;;  %v974_v17 = vld [vmem:[#allocation2 + $0xb8] sm:$0xff]  ;;  %v892_v18 = vadd.f32 %v826_v16, %v362_v12  ;;  %v381_v16 = vld [vmem:[#allocation2 + $0xe0] sm:$0xff] }
 0x104   : > { %v1010_v19 = vmul.f32 %v1914_v61, %v974_v17  ;;  %v959_v20 = vld [vmem:[#allocation2 + $0x40] sm:$0xff]  ;;  %940 = vst.msk [vmem:[#allocation2 + $0xc0] sm:$0xff] %vm320_vm0, %v907_v15 }
 0x105   : > { %v995_v21 = vmul.f32 %v1914_v61, %v959_v20  ;;  %925 = vst.msk [vmem:[#allocation2 + $0x48] sm:$0xff] %vm320_vm0, %v892_v18  ;;  %v776_v22 = vpop.f32.mrf.mxu2 }
 0x106   : > { %v1046_v23 = vadd.f32 %v1919_v0, %v1010_v19  ;;  %v865_v25 = vpop.f32.mrf.mxu3 }
 0x107   : > { %v1031_v26 = vadd.f32 %v1919_v0, %v995_v21  ;;  %v866_v27 = vadd.f32 %v865_v25, %v776_v22  ;;  %v739_v28 = vpop.f32.mrf.mxu0  ;;  %v366_v22 = vld [vmem:[#allocation2 + $0x68] sm:$0xff] }
 0x108   : > { %v1078_v29 = vmax.f32 %v1046_v23, 0.0  ;;  %v828_v31 = vpop.f32.mrf.mxu1 }
 0x109   : > { %v1063_v32 = vmax.f32 %v1031_v26, 0.0  ;;  %v908_v33 = vadd.f32 %v866_v27, %v378_v24  ;;  %v829_v34 = vadd.f32 %v828_v31, %v739_v28 }
 0x10a   : > { %1110 = vst.msk [vmem:[%s1928_s28 + $0xb8] sm:$0xff] %vm320_vm0, %v1078_v29 }
 0x10b   : > { %1095 = vst.msk [vmem:[%s1928_s28 + $0x40] sm:$0xff] %vm320_vm0, %v1063_v32  ;;  %v975_v35 = vld [vmem:[#allocation2 + $0xc0] sm:$0xff]  ;;  %v893_v36 = vadd.f32 %v829_v34, %v363_v30  ;;  %v382_v34 = vld [vmem:[#allocation2 + $0xe8] sm:$0xff] }
 0x10c   : > { %v1011_v37 = vmul.f32 %v1914_v61, %v975_v35  ;;  %v960_v38 = vld [vmem:[#allocation2 + $0x48] sm:$0xff]  ;;  %941 = vst.msk [vmem:[#allocation2 + $0xc8] sm:$0xff] %vm320_vm0, %v908_v33 }
 0x10d   : > { %v996_v39 = vmul.f32 %v1914_v61, %v960_v38  ;;  %926 = vst.msk [vmem:[#allocation2 + $0x50] sm:$0xff] %vm320_vm0, %v893_v36  ;;  %v779_v40 = vpop.f32.mrf.mxu2 }
 0x10e   : > { %v1047_v41 = vadd.f32 %v1919_v0, %v1011_v37  ;;  %v868_v43 = vpop.f32.mrf.mxu3 }
 0x10f   : > { %v1032_v44 = vadd.f32 %v1919_v0, %v996_v39  ;;  %v869_v45 = vadd.f32 %v868_v43, %v779_v40  ;;  %v741_v46 = vpop.f32.mrf.mxu0  ;;  %v367_v40 = vld [vmem:[#allocation2 + $0x70] sm:$0xff] }
 0x110   : > { %v1079_v47 = vmax.f32 %v1047_v41, 0.0  ;;  %v830_v49 = vpop.f32.mrf.mxu1 }
 0x111   : > { %v1064_v50 = vmax.f32 %v1032_v44, 0.0  ;;  %v909_v51 = vadd.f32 %v869_v45, %v379_v42  ;;  %v831_v52 = vadd.f32 %v830_v49, %v741_v46 }
 0x112   : > { %1111 = vst.msk [vmem:[%s1928_s28 + $0xc0] sm:$0xff] %vm320_vm0, %v1079_v47 }
 0x113   : > { %1096 = vst.msk [vmem:[%s1928_s28 + $0x48] sm:$0xff] %vm320_vm0, %v1064_v50  ;;  %v976_v53 = vld [vmem:[#allocation2 + $0xc8] sm:$0xff]  ;;  %v894_v54 = vadd.f32 %v831_v52, %v364_v48  ;;  %v383_v52 = vld [vmem:[#allocation2 + $0xf0] sm:$0xff] }
 0x114   : > { %v1012_v55 = vmul.f32 %v1914_v61, %v976_v53  ;;  %v961_v56 = vld [vmem:[#allocation2 + $0x50] sm:$0xff]  ;;  %942 = vst.msk [vmem:[#allocation2 + $0xd0] sm:$0xff] %vm320_vm0, %v909_v51 }
 0x115   : > { %v997_v57 = vmul.f32 %v1914_v61, %v961_v56  ;;  %927 = vst.msk [vmem:[#allocation2 + $0x58] sm:$0xff] %vm320_vm0, %v894_v54  ;;  %v781_v58 = vpop.f32.mrf.mxu2 }
 0x116   : > { %v1048_v59 = vadd.f32 %v1919_v0, %v1012_v55  ;;  %v870_v62 = vpop.f32.mrf.mxu3 }
 0x117   : > { %v1033_v63 = vadd.f32 %v1919_v0, %v997_v57  ;;  %v871_v1 = vadd.f32 %v870_v62, %v781_v58  ;;  %v744_v2 = vpop.f32.mrf.mxu0  ;;  %v368_v58 = vld [vmem:[#allocation2 + $0x78] sm:$0xff] }
 0x118   : > { %v1080_v3 = vmax.f32 %v1048_v59, 0.0  ;;  %v833_v5 = vpop.f32.mrf.mxu1 }
 0x119   : > { %v1065_v6 = vmax.f32 %v1033_v63, 0.0  ;;  %v910_v7 = vadd.f32 %v871_v1, %v380_v60  ;;  %v834_v8 = vadd.f32 %v833_v5, %v744_v2 }
 0x11a   : > { %1112 = vst.msk [vmem:[%s1928_s28 + $0xc8] sm:$0xff] %vm320_vm0, %v1080_v3 }
 0x11b   : > { %1097 = vst.msk [vmem:[%s1928_s28 + $0x50] sm:$0xff] %vm320_vm0, %v1065_v6  ;;  %v977_v9 = vld [vmem:[#allocation2 + $0xd0] sm:$0xff]  ;;  %v895_v10 = vadd.f32 %v834_v8, %v365_v4  ;;  %v384_v8 = vld [vmem:[#allocation2 + $0xf8] sm:$0xff] }
 0x11c   : > { %v1013_v11 = vmul.f32 %v1914_v61, %v977_v9  ;;  %v962_v12 = vld [vmem:[#allocation2 + $0x58] sm:$0xff]  ;;  %943 = vst.msk [vmem:[#allocation2 + $0xd8] sm:$0xff] %vm320_vm0, %v910_v7 }
 0x11d   : > { %v998_v13 = vmul.f32 %v1914_v61, %v962_v12  ;;  %928 = vst.msk [vmem:[#allocation2 + $0x60] sm:$0xff] %vm320_vm0, %v895_v10  ;;  %v784_v14 = vpop.f32.mrf.mxu2 }
 0x11e   : > { %v1049_v15 = vadd.f32 %v1919_v0, %v1013_v11  ;;  %v873_v17 = vpop.f32.mrf.mxu3 }
 0x11f   : > { %v1034_v18 = vadd.f32 %v1919_v0, %v998_v13  ;;  %v874_v19 = vadd.f32 %v873_v17, %v784_v14  ;;  %v746_v20 = vpop.f32.mrf.mxu0 }
 0x120   : > { %v1081_v21 = vmax.f32 %v1049_v15, 0.0  ;;  %v835_v23 = vpop.f32.mrf.mxu1 }
 0x121   : > { %v1066_v24 = vmax.f32 %v1034_v18, 0.0  ;;  %v911_v25 = vadd.f32 %v874_v19, %v381_v16  ;;  %v836_v26 = vadd.f32 %v835_v23, %v746_v20 }
 0x122   : > { %1113 = vst.msk [vmem:[%s1928_s28 + $0xd0] sm:$0xff] %vm320_vm0, %v1081_v21 }
 0x123   : > { %1098 = vst.msk [vmem:[%s1928_s28 + $0x58] sm:$0xff] %vm320_vm0, %v1066_v24  ;;  %v978_v27 = vld [vmem:[#allocation2 + $0xd8] sm:$0xff]  ;;  %v896_v28 = vadd.f32 %v836_v26, %v366_v22 }
 0x124   : > { %v1014_v29 = vmul.f32 %v1914_v61, %v978_v27  ;;  %v963_v30 = vld [vmem:[#allocation2 + $0x60] sm:$0xff]  ;;  %944 = vst.msk [vmem:[#allocation2 + $0xe0] sm:$0xff] %vm320_vm0, %v911_v25 }
 0x125   : > { %v999_v31 = vmul.f32 %v1914_v61, %v963_v30  ;;  %929 = vst.msk [vmem:[#allocation2 + $0x68] sm:$0xff] %vm320_vm0, %v896_v28  ;;  %v786_v32 = vpop.f32.mrf.mxu2 }
 0x126   : > { %v1050_v33 = vadd.f32 %v1919_v0, %v1014_v29  ;;  %v875_v35 = vpop.f32.mrf.mxu3 }
 0x127   : > { %v1035_v36 = vadd.f32 %v1919_v0, %v999_v31  ;;  %v876_v37 = vadd.f32 %v875_v35, %v786_v32  ;;  %v749_v38 = vpop.f32.mrf.mxu0 }
 0x128   : > { %v1082_v39 = vmax.f32 %v1050_v33, 0.0  ;;  %v838_v41 = vpop.f32.mrf.mxu1 }
 0x129   : > { %v1067_v42 = vmax.f32 %v1035_v36, 0.0  ;;  %v912_v43 = vadd.f32 %v876_v37, %v382_v34  ;;  %v839_v44 = vadd.f32 %v838_v41, %v749_v38 }
 0x12a   : > { %1114 = vst.msk [vmem:[%s1928_s28 + $0xd8] sm:$0xff] %vm320_vm0, %v1082_v39 }
 0x12b   : > { %1099 = vst.msk [vmem:[%s1928_s28 + $0x60] sm:$0xff] %vm320_vm0, %v1067_v42  ;;  %v979_v45 = vld [vmem:[#allocation2 + $0xe0] sm:$0xff]  ;;  %v897_v46 = vadd.f32 %v839_v44, %v367_v40 }
 0x12c   : > { %v1015_v47 = vmul.f32 %v1914_v61, %v979_v45  ;;  %v964_v48 = vld [vmem:[#allocation2 + $0x68] sm:$0xff]  ;;  %945 = vst.msk [vmem:[#allocation2 + $0xe8] sm:$0xff] %vm320_vm0, %v912_v43 }
 0x12d   : > { %v1000_v49 = vmul.f32 %v1914_v61, %v964_v48  ;;  %930 = vst.msk [vmem:[#allocation2 + $0x70] sm:$0xff] %vm320_vm0, %v897_v46  ;;  %v789_v50 = vpop.f32.mrf.mxu2 }
 0x12e   : > { %v1051_v51 = vadd.f32 %v1919_v0, %v1015_v47  ;;  %v878_v53 = vpop.f32.mrf.mxu3 }
 0x12f   : > { %v1036_v54 = vadd.f32 %v1919_v0, %v1000_v49  ;;  %v879_v55 = vadd.f32 %v878_v53, %v789_v50  ;;  %v751_v56 = vpop.f32.mrf.mxu0 }
 0x130   : > { %v1083_v57 = vmax.f32 %v1051_v51, 0.0  ;;  %v840_v59 = vpop.f32.mrf.mxu1 }
 0x131   : > { %v1068_v60 = vmax.f32 %v1036_v54, 0.0  ;;  %v913_v62 = vadd.f32 %v879_v55, %v383_v52  ;;  %v841_v63 = vadd.f32 %v840_v59, %v751_v56 }
 0x132   : > { %1115 = vst.msk [vmem:[%s1928_s28 + $0xe0] sm:$0xff] %vm320_vm0, %v1083_v57 }
 0x133   : > { %1100 = vst.msk [vmem:[%s1928_s28 + $0x68] sm:$0xff] %vm320_vm0, %v1068_v60  ;;  %v980_v1 = vld [vmem:[#allocation2 + $0xe8] sm:$0xff]  ;;  %v898_v2 = vadd.f32 %v841_v63, %v368_v58 }
 0x134   : > { %v1016_v3 = vmul.f32 %v1914_v61, %v980_v1  ;;  %v965_v4 = vld [vmem:[#allocation2 + $0x70] sm:$0xff]  ;;  %946 = vst.msk [vmem:[#allocation2 + $0xf0] sm:$0xff] %vm320_vm0, %v913_v62 }
 0x135   : > { %v1001_v5 = vmul.f32 %v1914_v61, %v965_v4  ;;  %931 = vst.msk [vmem:[#allocation2 + $0x78] sm:$0xff] %vm320_vm0, %v898_v2  ;;  %v791_v6 = vpop.f32.mrf.mxu2 }
 0x136   : > { %v1052_v7 = vadd.f32 %v1919_v0, %v1016_v3  ;;  %v880_v9 = vpop.f32.mrf.mxu3 }
 0x137   : > { %v1037_v10 = vadd.f32 %v1919_v0, %v1001_v5  ;;  %v881_v11 = vadd.f32 %v880_v9, %v791_v6 }
 0x138   : > { %v1084_v12 = vmax.f32 %v1052_v7, 0.0 }
 0x139   : > { %v1069_v13 = vmax.f32 %v1037_v10, 0.0  ;;  %v914_v14 = vadd.f32 %v881_v11, %v384_v8 }
 0x13a   : > { %1116 = vst.msk [vmem:[%s1928_s28 + $0xe8] sm:$0xff] %vm320_vm0, %v1084_v12 }
 0x13b   : > { %1101 = vst.msk [vmem:[%s1928_s28 + $0x70] sm:$0xff] %vm320_vm0, %v1069_v13  ;;  %v981_v15 = vld [vmem:[#allocation2 + $0xf0] sm:$0xff] }
 0x13c   : > { %v1017_v16 = vmul.f32 %v1914_v61, %v981_v15  ;;  %v966_v17 = vld [vmem:[#allocation2 + $0x78] sm:$0xff]  ;;  %947 = vst.msk [vmem:[#allocation2 + $0xf8] sm:$0xff] %vm320_vm0, %v914_v14 }
 0x13d   : > { %v1002_v18 = vmul.f32 %v1914_v61, %v966_v17 }
 0x13e   : > { %v1053_v19 = vadd.f32 %v1919_v0, %v1017_v16 }
 0x13f   : > { %v1038_v20 = vadd.f32 %v1919_v0, %v1002_v18 }
 0x140   : > { %v1085_v21 = vmax.f32 %v1053_v19, 0.0 }
 0x141   : > { %v1070_v22 = vmax.f32 %v1038_v20, 0.0 }
 0x142   : > { %1117 = vst.msk [vmem:[%s1928_s28 + $0xf0] sm:$0xff] %vm320_vm0, %v1085_v21 }
 0x143   : > { %1102 = vst.msk [vmem:[%s1928_s28 + $0x78] sm:$0xff] %vm320_vm0, %v1070_v22  ;;  %v982_v23 = vld [vmem:[#allocation2 + $0xf8] sm:$0xff] }
 0x144   : > { %v1018_v24 = vmul.f32 %v1914_v61, %v982_v23 }
 0x146   : > { %v1054_v25 = vadd.f32 %v1919_v0, %v1018_v24 }
 0x148   : > { %v1086_v26 = vmax.f32 %v1054_v25, 0.0 }
 0x14a   : > { %1118 = vst.msk [vmem:[%s1928_s28 + $0xf8] sm:$0xff] %vm320_vm0, %v1086_v26 }
 0x14b PF: > { %s17_s20 = sadd.s32 1, %s1668_s20   ;;  %s2110_s15 = smov %s1652_s16 }
 0x14c   : > { %p14_p0 = scmp.ge.s32.totalorder %s17_s20, 10   ;;  %s2111_s16 = smov %s1656_s17 }
 0x14d   : > { %s2112_s17 = smov %s1747_s27  ;;  %s2113_s18 = smov %s1664_s19 }
 0x14e   : > { %s2114_s19 = smov %s2116_s22  ;;  %16 = sbr.rel (!%p14_p0) target bundleno = 4 (0x4), region = 93 }
 0x153   :  { %1147 = vsyncpa [#allocation4], 1 }
 0x154   :  { %1149 = vsyncpa [#allocation4 + $0x1], 1 }

</bundles_post_ra>
